<compile_context>
chip_gen: v7x
topology: tpu7x:2x2x1
jax: 0.10.0
libtpu: 0.0.40
codegen_flags: <defaults>
</compile_context>

<pallas_src>
import functools

import numpy as np
import jax
import jax.numpy as jnp
from jax.experimental import pallas as pl
from jax.experimental.pallas import tpu as pltpu


_NEG_BIG = -1e30                     # finite "-inf" for padded class columns
_LANES = 128
_SUBLANES = 8
_NUM_CORES = 2                       # v7x: 2 TensorCores; serial (correct) elsewhere
_TILE_BYTES_BUDGET = 8 * 1024 * 1024 # per pred tile buffer
_MAX_TILE_ROWS = 1024


def _round_up(x, m):
    return ((x + m - 1) // m) * m


def _vs_loss_kernel(n_valid, pred_ref, target_ref, inv_delta_ref, iota_ref,
                    out_ref, acc_ref):
    core = pl.program_id(0)          # "parallel" axis (per-TensorCore split)
    step = pl.program_id(1)          # "arbitrary" accumulation axis over batch tiles
    n_steps = pl.num_programs(1)

    @pl.when(step == 0)
    def _():
        acc_ref[0] = jnp.float32(0.0)

    # Load tile in native dtype, upcast in-register; scale with a multiply.
    x = pred_ref[...].astype(jnp.float32)                 # (TILE_N, C_pad)
    z = x * inv_delta_ref[...] + iota_ref[...]            # vector-scaling adjust

    # Numerically-stable log-sum-exp over classes (padded cols are ~-inf).
    m = jnp.max(z, axis=-1, keepdims=True)                # (TILE_N, 1)
    lse = m + jnp.log(jnp.sum(jnp.exp(z - m), axis=-1, keepdims=True))

    tn, cp = z.shape
    col_ids = jax.lax.broadcasted_iota(jnp.int32, (tn, cp), 1)
    # Select-based pick of the target logit (no f32 onehot, no 0*inf NaN risk).
    # Targets are assumed to be valid class indices in [0, C).
    picked = jnp.sum(jnp.where(col_ids == target_ref[...], z, 0.0),
                     axis=-1, keepdims=True)              # (TILE_N, 1)

    per_example = lse - picked                            # (TILE_N, 1)

    # Mask rows that are padding (batch tail / per-core padding).
    row_ids = jax.lax.broadcasted_iota(jnp.int32, (tn, 1), 0)
    global_row = (core * n_steps + step) * tn + row_ids
    per_example = jnp.where(global_row < n_valid, per_example, 0.0)

    # Accumulate this core's running sum in SMEM.
    acc_ref[0] = acc_ref[0] + jnp.sum(per_example)

    @pl.when(step == n_steps - 1)
    def _():
        # One lane-dense (8, 128) store per core holding its partial sum.
        out_ref[...] = jnp.full(out_ref.shape, acc_ref[0], dtype=jnp.float32)


def vs_loss_params(cls_num_list, gamma=0.3, tau=1.0):
    """Deterministic parameter setup mirroring VSLoss.__init__."""
    cls_num_list = np.asarray(cls_num_list, dtype=np.float64)
    cls_probs = cls_num_list / cls_num_list.sum()
    temp = (1.0 / cls_num_list) ** gamma
    temp = temp / temp.min()
    iota_list = tau * np.log(cls_probs)
    delta_list = temp
    return (jnp.asarray(delta_list, dtype=jnp.float32)[None, :],
            jnp.asarray(iota_list, dtype=jnp.float32)[None, :])


def vs_loss(pred, target, delta_list, iota_list):
    """pred: [N, C] float (f32 or bf16), target: [N] int -> scalar f32 loss."""
    # TODO(synk): per-class `weight` (weighted mean) not implemented; module default is None.
    n, c = pred.shape
    c_pad = _round_up(c, _LANES)

    # Precompute 1/Delta once (host/XLA side) so the kernel multiplies.
    inv_delta = (1.0 / delta_list).astype(jnp.float32)

    # Batch-tile sizing: fit the VMEM budget (v7x has the smallest VMEM).
    itemsize = pred.dtype.itemsize
    tile_n = _TILE_BYTES_BUDGET // (c_pad * itemsize)
    tile_n = max(_SUBLANES, min(_MAX_TILE_ROWS, (tile_n // _SUBLANES) * _SUBLANES))
    rows_per_core = _round_up(-(-n // _NUM_CORES), _SUBLANES)
    tile_n = min(tile_n, rows_per_core)
    steps_per_core = -(-rows_per_core // tile_n)
    n_pad = _NUM_CORES * steps_per_core * tile_n

    # Pad: extra rows masked in-kernel; extra class columns get iota = -1e30.
    pred_p = jnp.pad(pred, ((0, n_pad - n), (0, c_pad - c)))
    target_p = jnp.pad(target.astype(jnp.int32), (0, n_pad - n)).reshape(n_pad, 1)
    inv_delta_p = jnp.pad(inv_delta, ((0, 0), (0, c_pad - c)))
    iota_p = jnp.pad(iota_list.astype(jnp.float32), ((0, 0), (0, c_pad - c)),
                     constant_values=_NEG_BIG)

    partials = pl.pallas_call(
        functools.partial(_vs_loss_kernel, n),
        out_shape=jax.ShapeDtypeStruct((_NUM_CORES * _SUBLANES, _LANES), jnp.float32),
        grid_spec=pltpu.PrefetchScalarGridSpec(
            num_scalar_prefetch=0,
            grid=(_NUM_CORES, steps_per_core),
            in_specs=[
                pl.BlockSpec((tile_n, c_pad),
                             lambda cr, s: (cr * steps_per_core + s, 0)),  # pred tile
                pl.BlockSpec((tile_n, 1),
                             lambda cr, s: (cr * steps_per_core + s, 0)),  # target tile
                pl.BlockSpec((1, c_pad), lambda cr, s: (0, 0)),            # 1/Delta (resident)
                pl.BlockSpec((1, c_pad), lambda cr, s: (0, 0)),            # iota (resident)
            ],
            out_specs=pl.BlockSpec((_SUBLANES, _LANES), lambda cr, s: (cr, 0)),
            scratch_shapes=[pltpu.SMEM((1,), jnp.float32)],
        ),
        compiler_params=pltpu.CompilerParams(
            dimension_semantics=("parallel", "arbitrary"),
            vmem_limit_bytes=48 * 1024 * 1024,
        ),
    )(pred_p, target_p, inv_delta_p, iota_p)

    # Each core's (8, 128) block is filled with its partial sum; read one value
    # per core, sum the partials, and divide by the *global* batch size.
    total = jnp.sum(partials[0::_SUBLANES, 0])
    return total / jnp.float32(n)


def _reference_vs_loss(pred, target, delta_list, iota_list):
    z = pred.astype(jnp.float32) / delta_list + iota_list
    logp = jax.nn.log_softmax(z, axis=-1)
    picked = jnp.take_along_axis(logp, target[:, None].astype(jnp.int32), axis=-1)[:, 0]
    return -jnp.mean(picked)


if __name__ == "__main__":
    key = jax.random.PRNGKey(0)
    N, C = 8, 4                       # batch of 8 logits over 4 classes
    cls_num_list = [50, 30, 15, 5]    # synthetic class counts (len == C)

    k1, k2 = jax.random.split(key)
    pred = jax.random.normal(k1, (N, C), dtype=jnp.float32)
    target = jax.random.randint(k2, (N,), 0, C, dtype=jnp.int32)

    delta_list, iota_list = vs_loss_params(cls_num_list, gamma=0.3, tau=1.0)

    loss = vs_loss(pred, target, delta_list, iota_list)
    jax.block_until_ready(loss)

    ref = _reference_vs_loss(pred, target, delta_list, iota_list)
    assert jnp.allclose(loss, ref, atol=1e-5, rtol=1e-5), (loss, ref)

    print("KERNEL_OK")
</pallas_src>

<mosaic_0001>
module attributes {stable_mosaic.version = 11 : i64} {
  func.func @_vs_loss_kernel(%arg0: i32, %arg1: i32, %arg2: memref<8x128xf32, #tpu.memory_space<vmem>>, %arg3: memref<8x1xi32, #tpu.memory_space<vmem>>, %arg4: memref<1x128xf32, #tpu.memory_space<vmem>>, %arg5: memref<1x128xf32, #tpu.memory_space<vmem>>, %arg6: memref<8x128xf32, #tpu.memory_space<vmem>>, %arg7: memref<1xf32, #tpu.memory_space<smem>>) attributes {dimension_semantics = [#tpu.dimension_semantics<parallel>, #tpu.dimension_semantics<arbitrary>], iteration_bounds = array<i64: 2, 1>, scalar_prefetch = 0 : i64, scratch_operands = 1 : i64, tpu.core_type = #tpu.core_type<tc>, window_params = [{transform_indices = @transform_0, window_bounds = array<i64: 8, 128>}, {transform_indices = @transform_1, window_bounds = array<i64: 8, 1>}, {pipeline_mode = #tpu.pipeline_mode<synchronous>, transform_indices = @transform_2, window_bounds = array<i64: 1, 128>}, {pipeline_mode = #tpu.pipeline_mode<synchronous>, transform_indices = @transform_3, window_bounds = array<i64: 1, 128>}, {transform_indices = @transform_4, window_bounds = array<i64: 8, 128>}]} {
    %c0_i32 = arith.constant 0 : i32
    %0 = arith.cmpi eq, %arg1, %c0_i32 : i32
    %1 = arith.extui %0 : i1 to i32
    %c0_i32_0 = arith.constant 0 : i32
    %2 = arith.cmpi ne, %1, %c0_i32_0 : i32
    scf.if %2 {
      %cst_18 = arith.constant 0.000000e+00 : f32
      %c0_19 = arith.constant 0 : index
      %48 = memref.load %arg7[%c0_19] : memref<1xf32, #tpu.memory_space<smem>>
      memref.store %cst_18, %arg7[%c0_19] : memref<1xf32, #tpu.memory_space<smem>>
    } else {
    }
    %c0 = arith.constant 0 : index
    %c0_1 = arith.constant 0 : index
    %3 = vector.load %arg2[%c0, %c0_1] : memref<8x128xf32, #tpu.memory_space<vmem>>, vector<8x128xf32>
    %c0_2 = arith.constant 0 : index
    %c0_3 = arith.constant 0 : index
    %4 = vector.load %arg4[%c0_2, %c0_3] : memref<1x128xf32, #tpu.memory_space<vmem>>, vector<1x128xf32>
    %5 = vector.broadcast %4 : vector<1x128xf32> to vector<8x128xf32>
    %6 = arith.mulf %3, %5 : vector<8x128xf32>
    %c0_4 = arith.constant 0 : index
    %c0_5 = arith.constant 0 : index
    %7 = vector.load %arg5[%c0_4, %c0_5] : memref<1x128xf32, #tpu.memory_space<vmem>>, vector<1x128xf32>
    %8 = vector.broadcast %7 : vector<1x128xf32> to vector<8x128xf32>
    %9 = arith.addf %6, %8 : vector<8x128xf32>
    %cst = arith.constant dense<0xFF800000> : vector<8xf32>
    %10 = vector.multi_reduction <maximumf>, %9, %cst [1] : vector<8x128xf32> to vector<8xf32>
    %11 = vector.shape_cast %10 : vector<8xf32> to vector<8x1xf32>
    %12 = vector.broadcast %11 : vector<8x1xf32> to vector<8x128xf32>
    %13 = arith.subf %9, %12 : vector<8x128xf32>
    %14 = math.exp %13 : vector<8x128xf32>
    %cst_6 = arith.constant dense<0.000000e+00> : vector<8xf32>
    %15 = vector.multi_reduction <add>, %14, %cst_6 [1] : vector<8x128xf32> to vector<8xf32>
    %16 = vector.shape_cast %15 : vector<8xf32> to vector<8x1xf32>
    %17 = math.log %16 : vector<8x1xf32>
    %18 = arith.addf %11, %17 : vector<8x1xf32>
    %19 = tpu.iota {dimensions = array<i32: 1>} : vector<8x128xi32>
    %c0_7 = arith.constant 0 : index
    %c0_8 = arith.constant 0 : index
    %20 = vector.load %arg3[%c0_7, %c0_8] : memref<8x1xi32, #tpu.memory_space<vmem>>, vector<8x1xi32>
    %21 = vector.broadcast %20 : vector<8x1xi32> to vector<8x128xi32>
    %22 = arith.cmpi eq, %19, %21 : vector<8x128xi32>
    %cst_9 = arith.constant 0.000000e+00 : f32
    %23 = vector.broadcast %cst_9 : f32 to vector<8x128xf32>
    %24 = arith.select %22, %9, %23 : vector<8x128xi1>, vector<8x128xf32>
    %cst_10 = arith.constant dense<0.000000e+00> : vector<8xf32>
    %25 = vector.multi_reduction <add>, %24, %cst_10 [1] : vector<8x128xf32> to vector<8xf32>
    %26 = vector.shape_cast %25 : vector<8xf32> to vector<8x1xf32>
    %27 = arith.subf %18, %26 : vector<8x1xf32>
    %28 = tpu.iota {dimensions = array<i32: 0>} : vector<8x1xi32>
    %c1_i32 = arith.constant 1 : i32
    %29 = arith.muli %arg0, %c1_i32 : i32
    %30 = arith.addi %29, %arg1 : i32
    %c8_i32 = arith.constant 8 : i32
    %31 = arith.muli %30, %c8_i32 : i32
    %32 = vector.broadcast %31 : i32 to vector<8x1xi32>
    %33 = arith.addi %32, %28 : vector<8x1xi32>
    %c8_i32_11 = arith.constant 8 : i32
    %34 = vector.broadcast %c8_i32_11 : i32 to vector<8x1xi32>
    %35 = arith.cmpi slt, %33, %34 : vector<8x1xi32>
    %cst_12 = arith.constant 0.000000e+00 : f32
    %36 = vector.broadcast %cst_12 : f32 to vector<8x1xf32>
    %37 = arith.select %35, %27, %36 : vector<8x1xi1>, vector<8x1xf32>
    %c0_13 = arith.constant 0 : index
    %38 = memref.load %arg7[%c0_13] : memref<1xf32, #tpu.memory_space<smem>>
    %39 = vector.shape_cast %37 : vector<8x1xf32> to vector<1x8x1xf32>
    %cst_14 = arith.constant dense<0.000000e+00> : vector<1xf32>
    %40 = vector.multi_reduction <add>, %39, %cst_14 [1, 2] : vector<1x8x1xf32> to vector<1xf32>
    %41 = vector.shape_cast %40 : vector<1xf32> to vector<1x1x1xf32>
    %42 = vector.extract %41[0, 0, 0] : f32 from vector<1x1x1xf32>
    %43 = arith.addf %38, %42 : f32
    %c0_15 = arith.constant 0 : index
    %44 = memref.load %arg7[%c0_15] : memref<1xf32, #tpu.memory_space<smem>>
    memref.store %43, %arg7[%c0_15] : memref<1xf32, #tpu.memory_space<smem>>
    %c0_i32_16 = arith.constant 0 : i32
    %45 = arith.cmpi eq, %arg1, %c0_i32_16 : i32
    %46 = arith.extui %45 : i1 to i32
    %c0_i32_17 = arith.constant 0 : i32
    %47 = arith.cmpi ne, %46, %c0_i32_17 : i32
    scf.if %47 {
      %c0_18 = arith.constant 0 : index
      %48 = memref.load %arg7[%c0_18] : memref<1xf32, #tpu.memory_space<smem>>
      %49 = vector.broadcast %48 : f32 to vector<8x128xf32>
      %c0_19 = arith.constant 0 : index
      %c0_20 = arith.constant 0 : index
      %50 = vector.load %arg6[%c0_19, %c0_20] : memref<8x128xf32, #tpu.memory_space<vmem>>, vector<8x128xf32>
      tpu.vector_store %arg6[%c0_19, %c0_20], %49 {strides = array<i32>} : memref<8x128xf32, #tpu.memory_space<vmem>>, vector<8x128xf32>,
    } else {
    }
    return
  }
  func.func @transform_0(%arg0: i32, %arg1: i32) -> (i32, i32) {
    %c1_i32 = arith.constant 1 : i32
    %0 = arith.muli %arg0, %c1_i32 : i32
    %1 = arith.addi %0, %arg1 : i32
    %c0_i32 = arith.constant 0 : i32
    %c0_i32_0 = arith.constant 0 : i32
    return %1, %c0_i32 : i32, i32
  }
  func.func @transform_1(%arg0: i32, %arg1: i32) -> (i32, i32) {
    %c1_i32 = arith.constant 1 : i32
    %0 = arith.muli %arg0, %c1_i32 : i32
    %1 = arith.addi %0, %arg1 : i32
    %c0_i32 = arith.constant 0 : i32
    %c0_i32_0 = arith.constant 0 : i32
    return %1, %c0_i32 : i32, i32
  }
  func.func @transform_2(%arg0: i32, %arg1: i32) -> (i32, i32) {
    %c0_i32 = arith.constant 0 : i32
    %c0_i32_0 = arith.constant 0 : i32
    %c0_i32_1 = arith.constant 0 : i32
    return %c0_i32, %c0_i32_0 : i32, i32
  }
  func.func @transform_3(%arg0: i32, %arg1: i32) -> (i32, i32) {
    %c0_i32 = arith.constant 0 : i32
    %c0_i32_0 = arith.constant 0 : i32
    %c0_i32_1 = arith.constant 0 : i32
    return %c0_i32, %c0_i32_0 : i32, i32
  }
  func.func @transform_4(%arg0: i32, %arg1: i32) -> (i32, i32) {
    %c0_i32 = arith.constant 0 : i32
    %c0_i32_0 = arith.constant 0 : i32
    return %arg0, %c0_i32 : i32, i32
  }
}

</mosaic_0001>

<bundles_post_ra>
// kernel: tpu_custom_call.1
= control target key start
LH: loop header
LB: loop body
LE: loop exit
PB: predicated region body
PF: predicated region fallthrough
CT: control target
= control target key end

     0   :  { %9 = vsyncpa [#allocation4], 0  ;;  %s709_s0 = inlined_call_operand.vmem [shape: f32[16,128], index: 0, kind: input, shape index: {}]   ;;  %s710_s1 = inlined_call_operand.vmem [shape: s32[16,1], index: 1, kind: input, shape index: {}]   ;;  %s711_s2 = inlined_call_operand.vmem [shape: f32[1,128], index: 2, kind: input, shape index: {}]   ;;  %s712_s3 = inlined_call_operand.vmem [shape: f32[1,128], index: 3, kind: input, shape index: {}]   ;;  %s713_s4 = inlined_call_operand.hbm [shape: f32[16,128], index: 4, kind: output, shape index: {}]  }
   0x1   :  { %11 = vsyncpa [#allocation4 + $0x1], 0  ;;  %s587_s15 = smov 0   ;;  %s589_s16 = smov 0  }
   0x2   :  { %s591_s17 = smov 0   ;;  %s593_s18 = smov 0  }
   0x3   :  { %s595_s19 = smov 0   ;;  %s597_s20 = smov 0  }
   0x4 LB: > { %s402_s21 = sadd.s32 4294967295, %s558_s20   ;;  %s403_s22 = sadd.s32 4294967294, %s558_s20   ;;  %s558_s20 = sphi %s597_s20, %s17_s20   ;;  %s554_s19 = sphi %s595_s19, %s720_s19   ;;  %s550_s18 = sphi %s593_s18, %s719_s18   ;;  %s546_s17 = sphi %s591_s17, %s718_s17   ;;  %s542_s16 = sphi %s589_s16, %s717_s16   ;;  %s538_s15 = sphi %s587_s15, %s716_s15  }
   0x5   : > { %s29_s23 = sadd.s32 1, %s554_s19  ;;  %s134_s24 = sadd.s32 1, %s546_s17 }
   0x6   : > { %p31_p0 = scmp.ge.s32.totalorder %s29_s23, 2  ;;  %p144_p1 = scmp.ne.s32.totalorder %s546_s17, %s542_s16 }
   0x7   : > { %p145_p2 = scmp.eq.s32.totalorder %s402_s21, 1  ;;  %p150_p3 = scmp.ne.s32.totalorder %s542_s16, %s538_s15 }
   0x8   : > { %s722_s23 = smov (%p31_p0, %s29_s23), 0  ;;  %p151_p5 = scmp.eq.s32.totalorder %s403_s22, 1 }
   0x9   : > { %p627_p4 = por %p145_p2, %p144_p1  ;;  %s131_s26 = ssub.s32 %s554_s19, %s722_s23 }
   0xa   : > { %p406_p6 = scmp.ge.s32.totalorder %s558_s20, 1  ;;  %p132_p7 = scmp.eq.s32.totalorder %s131_s26, 0 }
   0xb   : > { %p634_p8 = por %p151_p5, %p150_p3  ;;  %p193_p9 = scmp.lt.s32.totalorder %s558_s20, 3 }
   0xc   : > { %s640_s28 = scalar_select %p132_p7, %s546_s17, %s134_s24  }
   0xd   : > { %p194_p10 = pnand %p406_p6, %p193_p9 }
   0xe   : > { %p225_p11 = scmp.lt.s32.totalorder (!%p194_p10), %s550_s18, 1  ;;  %v560_v0 = vmov (!%p194_p10), 0   ;;  %v410_v1 = vld [vmem:[%s711_s2] ss:$0 sm:$0xff] (!%p194_p10)  ;;  %v269_v10 = vlaneseq (!%p194_p10)  ;;  %s412_s21 = sshll.u32 (!%p194_p10), %s550_s18, 3  ;;  %vm289_vm2 = vcmask (!%p194_p10), 7168  }
   0xf   : > { %197 = sbr.rel (%p194_p10) target bundleno = 568 (0x238), region = 36  ;;  %475 = vset.pattern.permute.xlu0 (!%p194_p10), %v560_v0  ;;  %v411_v3 = vld [vmem:[%s712_s3] ss:$0 sm:$0xff] (!%p194_p10)  ;;  %v284_v17 = vstv (!%p194_p10), %s412_s21  ;;  %s221_s22 = sand.u32 (!%p194_p10), 1, %s542_s16  }
  0x10   : > { %v270_v11 = vand.u32 (!%p194_p10), 127, %v269_v10  ;;  %v281_v16 = vshrl.u32 (!%p194_p10), %v269_v10, 7  ;;  %s407_s24 = sshll.u32 (!%p194_p10), %s221_s22, 3 }
  0x11   : > { %s223_s26 = scalar_lea.vmem (!%p194_p10), [#allocation3], %s407_s24 }
  0x12   : > { %v285_v19 = vadd.s32 (!%p194_p10), %v284_v17, %v281_v16 }
  0x14   : > { %vm286_vm1 = vcmp.lt.s32.totalorder (!%p194_p10), %v285_v19, 8 }
  0x16   : > { %s226_s29 = scalar_select %p225_p11, %s550_s18, 1 }
  0x18   : > { %s408_s30 = sshll.u32 %s226_s29, 3  ;;  %s323_s29 = sshll.u32 %s223_s26, 4  ;;  %s659_s29 = int_to_ptr.vmem [resolvable:$true] %s323_s29 }
  0x19   : > { %s228_s9 = scalar_lea.vmem %s709_s0, %s408_s30  ;;  %s234_s14 = scalar_lea.vmem %s710_s1, %s408_s30 }
  0x1a   : > { %v242_v2 = vld [vmem:[%s228_s9] sm:$0xff]  ;;  %s414_s30 = sshll.u32 %s550_s18, 7  ;;  %s310_s9 = scalar_lea.sflag [#allocation4], %s221_s22 }
  0x1b   : > { %v250_v4 = vmul.f32 %v410_v1, %v242_v2  ;;  %v271_v6 = vld [vmem:[%s234_s14] sm:$0xff]  ;;  %s664_s8 = scalar_lea.hbm %s713_s4, %s414_s30  ;;  %s480_s10 = scalar_lea.vmem %s659_s29, 128 }
  0x1c   : > { %p481_p12 = scmp.ne.s32.totalorder %s659_s29, %s480_s10  ;;  %s561_s18 = smov [#allocation3]  }
  0x1d   : > { %v258_v5 = vadd.f32 %v411_v3, %v250_v4  ;;  %s484_s11 = sshll.u32 %s561_s18, 4  ;;  %s485_s11 = int_to_ptr.vmem [resolvable:$false] %s484_s11 }
  0x1e   : > { %p482_p13 = pnand %p481_p12, %p627_p4  ;;  %s486_s12 = scalar_lea.vmem %s485_s11, 256 }
  0x1f   : > { %259 = vmax.xlane.f32.xlu0 %v258_v5  ;;  %p487_p1 = scmp.lt.s32.totalorder %s659_s29, %s485_s11  ;;  %p488_p2 = scmp.lt.s32.totalorder %s486_s12, %s480_s10 }
  0x20   : > { %p483_p0 = pneg %p482_p13 }
  0x21   : > { %p489_p3 = por %p488_p2, %p487_p1 }
  0x23   : > { %p490_p5 = pnand %p489_p3, %p483_p0 }
  0x35   : > { %273 = vperm.xlu0 %475, %v271_v6  }
  0xac   : > { %v260_v7 = vpop.xlane.xlu0 %259 }
  0xad   : > { %v261_v8 = vsub.f32 %v258_v5, %v260_v7 }
  0xaf   : > { %v262_v9 = vmul.f32 1.442695, %v261_v8 }
  0xb1   : > { %476 = vpow2.f32 %v262_v9 }
  0xb4   : > { %v274_v12 = vpop.permute.xlu0 %273 }
  0xb5   : > { %vm275_vm0 = vcmp.eq.s32.totalorder %v270_v11, %v274_v12 }
  0xb6   : > { %v276_v14 = vsel %vm275_vm0, %v258_v5, 0.0 }
  0xbb   : > { %v477_v13 = vpop.eup %476 }
  0xbc   : > { %264 = vadd.xlane.f32.xlu1 %v477_v13 }
  0xc0   : > { %277 = vadd.xlane.f32.xlu1 %v276_v14 }
 0x149   : > { %v265_v15 = vpop.xlane.xlu1 %264 }
 0x14a   : > { %478 = vlog2.f32 %v265_v15 }
 0x14d   : > { %v278_v21 = vpop.xlane.xlu1 %277 }
 0x154   : > { %v479_v18 = vpop.eup %478 }
 0x155   : > { %v267_v20 = vmul.f32 0.6931472, %v479_v18 }
 0x157   : > { %v268_v22 = vadd.f32 %v267_v20, %v260_v7 }
 0x159   : > { %v279_v23 = vsub.f32 %v268_v22, %v278_v21 }
 0x15b   : > { %v287_v24 = vsel %vm286_vm1, %v279_v23, 0.0 }
 0x15c   : > { %v290_v25 = vsel %vm289_vm2, %v287_v24, 0.0 }
 0x15d   : > { %291 = vadd.xlane.f32.xlu1 %v290_v25 }
 0x1ea   : > { %v292_v26 = vpop.xlane.xlu1 %291 }
 0x1eb   : > { %v293_v27 = vrot.slane %v292_v26, 4 }
 0x1ed   : > { %v294_v28 = vadd.f32 %v293_v27, %v292_v26 }
 0x1ef   : > { %v295_v29 = vrot.slane %v294_v28, 2 }
 0x1f1   : > { %v296_v30 = vadd.f32 %v295_v29, %v294_v28 }
 0x1f3   : > { %v297_v31 = vrot.slane %v296_v30, 1 }
 0x1f5   : > { %v298_v32 = vadd.f32 %v297_v31, %v296_v30 }
 0x1f7   : > { %417 = vpush %v298_v32 }
 0x228   : > { %s418_s5 = spop %417 }
 0x229   : > { %v307_v33 = vstv %s418_s5 }
 0x22a   : > { %308 = vst [vmem:[%s223_s26] sm:$0xff] %v307_v33 }
 0x22b   : > { %493 = shalt.err (!%p490_p5)
}
 0x22c   : > { %s494_s13 = scalar_lea.hbm %s664_s8, 128  ;;  %s498_s22 = scalar_lea.hbm %s713_s4, 256 }
 0x22d   : > { %p495_p6 = scmp.ne.s32.totalorder %s664_s8, %s494_s13  ;;  %p499_p10 = scmp.lt.u32.totalorder %s664_s8, %s713_s4 }
 0x22e   : > { %p500_p11 = scmp.lt.u32.totalorder %s498_s22, %s494_s13  ;;  %p502_p13 = scmp.lt.u32.totalorder %s494_s13, %s664_s8 }
 0x22f   : > { %p496_p7 = pnand %p495_p6, %p627_p4 }
 0x230   : > { %p501_p12 = por %p500_p11, %p499_p10 }
 0x231   : > { %p497_p9 = pneg %p496_p7 }
 0x232   : > { %p503_p0 = por %p502_p13, %p501_p12 }
 0x234   : > { %p504_p1 = pnand %p503_p0, %p497_p9 }
 0x236   : > { %507 = shalt.err (!%p504_p1)
}
 0x237   : > { %419 = dma.vmem_to_hbm [thread:$0]  (%p627_p4), %s659_s29, 128, %s664_s8, %s310_s9  }
 0x238 PF: > { %p425_p2 = scmp.ge.s32.totalorder %s558_s20, 2  ;;  %s335_s30 = sand.u32 1, %s538_s15  }
 0x239   : > { %s336_s5 = scalar_lea.sflag [#allocation4], %s335_s30 }
 0x23a   : > { %p422_p3 = pnand %p425_p2, %p634_p8 }
 0x23c   : > { %533 = dma.done.wait (!%p422_p3), %s336_s5, 128  }
 0x23d   : > { %535 = vsyncadd (!%p422_p3), %s336_s5, 4294967168  ;;  %s17_s20 = sadd.s32 1, %s558_s20   ;;  %s716_s15 = smov %s542_s16 }
 0x23e   : > { %p14_p5 = scmp.ge.s32.totalorder %s17_s20, 4   ;;  %s717_s16 = smov %s546_s17 }
 0x23f   : > { %s718_s17 = smov %s640_s28  ;;  %s719_s18 = smov %s554_s19 }
 0x240   : > { %s720_s19 = smov %s722_s23  ;;  %16 = sbr.rel (!%p14_p5) target bundleno = 4 (0x4), region = 84 }
 0x247   :  { %341 = vsyncpa [#allocation4], 1 }
 0x248   :  { %343 = vsyncpa [#allocation4 + $0x1], 1 }

</bundles_post_ra>
